<compile_context>
chip_gen: v5e
topology: v5e:2x2
jax: 0.10.0
libtpu: 0.0.40
codegen_flags: <defaults>
</compile_context>

<pallas_src>
import functools

import numpy as np
import jax
import jax.numpy as jnp
from jax.experimental import pallas as pl
from jax.experimental.pallas import tpu as pltpu

LANE = 128
SUBLANE = 8
FAST_PATH_MAX_N_PAD = 2048        # whole forward fits comfortably in VMEM
TILED_N_MULTIPLE = 1024           # tiled path pads N to this multiple


def _round_up(x, m):
    return ((x + m - 1) // m) * m


def _pick_tile(n_pad, candidates):
    for c in candidates:
        if n_pad % c == 0:
            return c
    return n_pad


def _vmem_limit_bytes():
    """Generation-aware VMEM budget (~72% of physical, capped at 100 MiB)."""
    cap = 64 * 1024 * 1024  # conservative fallback (v7x per-TC physical)
    try:
        info = pltpu.get_tpu_info()
        cap = int(getattr(info, "vmem_capacity_bytes", cap))
    except Exception:
        pass
    return max(32 * 1024 * 1024, min(int(cap * 0.72), 100 * 1024 * 1024))


def _padded_n(n):
    if n <= FAST_PATH_MAX_N_PAD:
        return _round_up(max(n, SUBLANE), LANE)
    return _round_up(n, TILED_N_MULTIPLE)


def _choose_tiles(n_pad):
    # tiled path only runs for n_pad >= 3072 (multiple of 1024), so the
    # "parallel" row axis always has >= 2 blocks (keeps both v7x TCs busy).
    tm = _pick_tile(n_pad, (512, 256, 128))
    tk = _pick_tile(n_pad, (2048, 1024, 512, 256, 128))
    return tm, tk


# ----------------------------------------------------------------------------
# Fast path: whole forward in one VMEM-resident kernel (small graphs)
# ----------------------------------------------------------------------------
def _fused_small_kernel(a_ref, x_ref, w1_ref, b1_ref, w2_ref, b2_ref, o_ref):
    a = a_ref[...]
    # Layer 1: (A @ X) @ W1 + b1, ReLU.  Reassociation is exact; bf16 rounding
    # of the intermediate matches the original two-pass error profile.
    ax = jnp.dot(a, x_ref[...], preferred_element_type=jnp.float32)
    h = jnp.dot(ax.astype(jnp.bfloat16), w1_ref[...],
                preferred_element_type=jnp.float32) + b1_ref[...]
    h = jnp.maximum(h, 0.0).astype(jnp.bfloat16)      # VPU
    # Dropout(p=0) is the identity.
    # Layer 2: (A @ H) @ W2 + b2, sigmoid.
    ah = jnp.dot(a, h, preferred_element_type=jnp.float32)
    y = jnp.dot(ah.astype(jnp.bfloat16), w2_ref[...],
                preferred_element_type=jnp.float32) + b2_ref[...]
    o_ref[...] = jax.nn.sigmoid(y)                    # EUP exp


def _fused_small(a, x, w1, b1, w2, b2, vmem_limit):
    n_pad, f_pad = x.shape
    return pl.pallas_call(
        _fused_small_kernel,
        out_shape=jax.ShapeDtypeStruct((n_pad, f_pad), jnp.float32),
        grid_spec=pltpu.PrefetchScalarGridSpec(
            num_scalar_prefetch=0,
            grid=(1,),
            in_specs=[
                pl.BlockSpec((n_pad, n_pad), lambda i: (0, 0)),
                pl.BlockSpec((n_pad, f_pad), lambda i: (0, 0)),
                pl.BlockSpec((f_pad, f_pad), lambda i: (0, 0)),
                pl.BlockSpec((1, f_pad), lambda i: (0, 0)),
                pl.BlockSpec((f_pad, f_pad), lambda i: (0, 0)),
                pl.BlockSpec((1, f_pad), lambda i: (0, 0)),
            ],
            out_specs=pl.BlockSpec((n_pad, f_pad), lambda i: (0, 0)),
        ),
        compiler_params=pltpu.CompilerParams(
            dimension_semantics=("arbitrary",),
            vmem_limit_bytes=vmem_limit,
        ),
    )(a, x, w1, b1, w2, b2)


# ----------------------------------------------------------------------------
# Tiled path: one fused kernel per GCN layer,  Y = act((A @ X) @ W + b)
# ----------------------------------------------------------------------------
def _layer_kernel(a_ref, x_ref, w_ref, b_ref, o_ref, acc_ref,
                  *, activation, tk, resident_x):
    k = pl.program_id(1)

    @pl.when(k == 0)
    def _():
        acc_ref[...] = jnp.zeros_like(acc_ref)

    if resident_x:
        start = pl.multiple_of(k * tk, tk)
        x_blk = x_ref[pl.ds(start, tk), :]     # X resident in VMEM, slice it
    else:
        x_blk = x_ref[...]                     # streamed (tk, f_pad) block
    acc_ref[...] += jnp.dot(a_ref[...], x_blk, preferred_element_type=jnp.float32)

    @pl.when(k == pl.num_programs(1) - 1)
    def _():
        # Finalize: apply the (tiny) weight matmul, bias and activation once.
        t = acc_ref[...].astype(jnp.bfloat16)
        y = jnp.dot(t, w_ref[...], preferred_element_type=jnp.float32) + b_ref[...]
        if activation == "relu":
            y = jnp.maximum(y, 0.0)            # VPU
        else:
            y = jax.nn.sigmoid(y)              # EUP
        o_ref[...] = y.astype(o_ref.dtype)


def _gcn_layer(a, x, w, b, *, tm, tk, activation, out_dtype,
               resident_x, vmem_limit):
    n_pad = a.shape[0]
    f_pad = x.shape[1]
    kernel = functools.partial(_layer_kernel, activation=activation,
                               tk=tk, resident_x=resident_x)
    if resident_x:
        # Constant index_map -> fetched once, stays resident across the grid.
        x_spec = pl.BlockSpec((n_pad, f_pad), lambda i, k: (0, 0))
    else:
        x_spec = pl.BlockSpec((tk, f_pad), lambda i, k: (k, 0))
    # TODO(synk): for realistic sparse graphs, replace the dense A stream with
    # a block-sparse PrefetchScalarGridSpec (compacted nonzero (i,k) blocks).
    return pl.pallas_call(
        kernel,
        out_shape=jax.ShapeDtypeStruct((n_pad, f_pad), out_dtype),
        grid_spec=pltpu.PrefetchScalarGridSpec(
            num_scalar_prefetch=0,
            grid=(n_pad // tm, n_pad // tk),
            in_specs=[
                pl.BlockSpec((tm, tk), lambda i, k: (i, k)),   # A_hat stream
                x_spec,                                        # X / H
                pl.BlockSpec((f_pad, f_pad), lambda i, k: (0, 0)),
                pl.BlockSpec((1, f_pad), lambda i, k: (0, 0)),
            ],
            out_specs=pl.BlockSpec((tm, f_pad), lambda i, k: (i, 0)),
            scratch_shapes=[pltpu.VMEM((tm, f_pad), jnp.float32)],
        ),
        compiler_params=pltpu.CompilerParams(
            dimension_semantics=("parallel", "arbitrary"),
            vmem_limit_bytes=vmem_limit,
        ),
    )(a, x, w, b)


# ----------------------------------------------------------------------------
# Hoisted (cacheable) data prep + hot-path forward
# ----------------------------------------------------------------------------
def prepare_gcn_params(a_hat, x, w1, b1, w2, b2):
    """Pad + bf16-cast ONCE. Reuse the returned dict across forward calls."""
    n, in_f = x.shape
    hid_f = w1.shape[1]
    out_f = w2.shape[1]

    n_pad = _padded_n(n)
    f_pad = max(_round_up(in_f, LANE), _round_up(hid_f, LANE),
                _round_up(out_f, LANE))

    a_p = jnp.zeros((n_pad, n_pad), jnp.bfloat16).at[:n, :n].set(
        a_hat.astype(jnp.bfloat16))
    x_p = jnp.zeros((n_pad, f_pad), jnp.bfloat16).at[:n, :in_f].set(
        x.astype(jnp.bfloat16))
    w1_p = jnp.zeros((f_pad, f_pad), jnp.bfloat16).at[:in_f, :hid_f].set(
        w1.astype(jnp.bfloat16))
    w2_p = jnp.zeros((f_pad, f_pad), jnp.bfloat16).at[:hid_f, :out_f].set(
        w2.astype(jnp.bfloat16))
    b1_p = jnp.zeros((1, f_pad), jnp.float32).at[:, :hid_f].set(
        jnp.reshape(b1, (1, -1)).astype(jnp.float32))
    b2_p = jnp.zeros((1, f_pad), jnp.float32).at[:, :out_f].set(
        jnp.reshape(b2, (1, -1)).astype(jnp.float32))
    return dict(a=a_p, x=x_p, w1=w1_p, b1=b1_p, w2=w2_p, b2=b2_p,
                n=n, out_f=out_f)


@jax.jit
def gcn_forward_padded(a_p, x_p, w1_p, b1_p, w2_p, b2_p):
    """Hot path: sigmoid(A @ relu(A @ X @ W1 + b1) @ W2 + b2) on padded ops."""
    n_pad = a_p.shape[0]
    vmem_limit = _vmem_limit_bytes()

    if n_pad <= FAST_PATH_MAX_N_PAD:
        # Single fully-VMEM-resident kernel: no grid steps, no HBM round trips.
        return _fused_small(a_p, x_p, w1_p, b1_p, w2_p, b2_p, vmem_limit)

    tm, tk = _choose_tiles(n_pad)
    # Keep X / H fully VMEM-resident across the k reduction when it fits
    # (generation-aware: ~1/3 of the VMEM budget), else stream (tk, f) blocks.
    resident_x = (n_pad * x_p.shape[1] * 2) <= (vmem_limit // 3)

    h = _gcn_layer(a_p, x_p, w1_p, b1_p, tm=tm, tk=tk, activation="relu",
                   out_dtype=jnp.bfloat16, resident_x=resident_x,
                   vmem_limit=vmem_limit)
    # Dropout(p=0) is the identity.
    # TODO(synk): nonzero-p dropout (training mode) not implemented.
    y = _gcn_layer(a_p, h, w2_p, b2_p, tm=tm, tk=tk, activation="sigmoid",
                   out_dtype=jnp.float32, resident_x=resident_x,
                   vmem_limit=vmem_limit)
    return y
    # TODO(synk): optional fp8 (v7x) / int8+row-scale (v5e/v6e) A_hat stream
    # to halve the dominant HBM traffic; needs an accuracy study first.


def gcn_forward(a_hat, x, w1, b1, w2, b2):
    """Convenience wrapper: prep (padding/cast) + padded forward + slice."""
    p = prepare_gcn_params(a_hat, x, w1, b1, w2, b2)
    y = gcn_forward_padded(p["a"], p["x"], p["w1"], p["b1"], p["w2"], p["b2"])
    return y[:p["n"], :p["out_f"]]


# ----------------------------------------------------------------------------
# Host-side glue (matches GCNConv's default symmetric normalization)
# ----------------------------------------------------------------------------
def normalize_adjacency(edge_row, edge_col, num_nodes):
    """Dense  A_hat = D^{-1/2} (A + I) D^{-1/2}."""
    a = np.zeros((num_nodes, num_nodes), dtype=np.float32)
    a[edge_row, edge_col] = 1.0
    a[edge_col, edge_row] = 1.0                     # undirected graph
    a = a + np.eye(num_nodes, dtype=np.float32)     # self loops
    deg = a.sum(axis=1)
    d_inv_sqrt = 1.0 / np.sqrt(np.maximum(deg, 1e-12))
    a_hat = (d_inv_sqrt[:, None] * a) * d_inv_sqrt[None, :]
    return jnp.asarray(a_hat, dtype=jnp.float32)


def glorot(key, fan_in, fan_out):
    limit = np.sqrt(6.0 / (fan_in + fan_out))
    return jax.random.uniform(key, (fan_in, fan_out), jnp.float32, -limit, limit)


if __name__ == "__main__":
    # Small deterministic problem consistent with GCN(in=14, hid=10, out=7).
    N, IN_F, HID_F, OUT_F = 16, 14, 10, 7

    key = jax.random.PRNGKey(0)
    k_x, k_w1, k_w2, k_e = jax.random.split(key, 4)

    # Node features [N, 14]
    x = jax.random.normal(k_x, (N, IN_F), dtype=jnp.float32)

    # Deterministic edge list (what adj_to_coo would yield): ring + chords.
    row = np.array(list(range(N)) + [0, 2, 5, 7], dtype=np.int64)
    col = np.array([(i + 1) % N for i in range(N)] + [8, 11, 13, 3], dtype=np.int64)
    a_hat = normalize_adjacency(row, col, N)

    # GCNConv parameters (glorot weights, zero bias), deterministic.
    w1 = glorot(k_w1, IN_F, HID_F)
    b1 = jnp.zeros((1, HID_F), dtype=jnp.float32)
    w2 = glorot(k_w2, HID_F, OUT_F)
    b2 = jnp.zeros((1, OUT_F), dtype=jnp.float32)

    # Hoisted, cacheable data prep (done once per graph/params).
    params = prepare_gcn_params(a_hat, x, w1, b1, w2, b2)
    y_pad = gcn_forward_padded(params["a"], params["x"], params["w1"],
                               params["b1"], params["w2"], params["b2"])
    y_pad = jax.block_until_ready(y_pad)
    out = np.asarray(y_pad)[:N, :OUT_F]

    # Plain-JAX f32 reference (kernel runs bf16 matmuls with f32 accumulation).
    ref_h = jnp.maximum(a_hat @ (x @ w1) + b1, 0.0)
    ref = jax.nn.sigmoid(a_hat @ (ref_h @ w2) + b2)
    assert out.shape == (N, OUT_F)
    assert np.allclose(out, np.asarray(ref), atol=2e-2), "mismatch vs reference"

    print("KERNEL_OK")
</pallas_src>

<mosaic_0001>
module attributes {stable_mosaic.version = 11 : i64} {
  func.func @_fused_small_kernel(%arg0: i32, %arg1: memref<128x128xbf16, #tpu.memory_space<vmem>>, %arg2: memref<128x128xbf16, #tpu.memory_space<vmem>>, %arg3: memref<128x128xbf16, #tpu.memory_space<vmem>>, %arg4: memref<1x128xf32, #tpu.memory_space<vmem>>, %arg5: memref<128x128xbf16, #tpu.memory_space<vmem>>, %arg6: memref<1x128xf32, #tpu.memory_space<vmem>>, %arg7: memref<128x128xf32, #tpu.memory_space<vmem>>) attributes {dimension_semantics = [#tpu.dimension_semantics<arbitrary>], iteration_bounds = array<i64: 1>, scalar_prefetch = 0 : i64, scratch_operands = 0 : i64, tpu.core_type = #tpu.core_type<tc>, window_params = [{pipeline_mode = #tpu.pipeline_mode<synchronous>, transform_indices = @transform_0, window_bounds = array<i64: 128, 128>}, {pipeline_mode = #tpu.pipeline_mode<synchronous>, transform_indices = @transform_1, window_bounds = array<i64: 128, 128>}, {pipeline_mode = #tpu.pipeline_mode<synchronous>, transform_indices = @transform_2, window_bounds = array<i64: 128, 128>}, {pipeline_mode = #tpu.pipeline_mode<synchronous>, transform_indices = @transform_3, window_bounds = array<i64: 1, 128>}, {pipeline_mode = #tpu.pipeline_mode<synchronous>, transform_indices = @transform_4, window_bounds = array<i64: 128, 128>}, {pipeline_mode = #tpu.pipeline_mode<synchronous>, transform_indices = @transform_5, window_bounds = array<i64: 1, 128>}, {pipeline_mode = #tpu.pipeline_mode<synchronous>, transform_indices = @transform_6, window_bounds = array<i64: 128, 128>}]} {
    %c0 = arith.constant 0 : index
    %c0_0 = arith.constant 0 : index
    %0 = vector.load %arg1[%c0, %c0_0] : memref<128x128xbf16, #tpu.memory_space<vmem>>, vector<128x128xbf16>
    %c0_1 = arith.constant 0 : index
    %c0_2 = arith.constant 0 : index
    %1 = vector.load %arg2[%c0_1, %c0_2] : memref<128x128xbf16, #tpu.memory_space<vmem>>, vector<128x128xbf16>
    %cst = arith.constant dense<0.000000e+00> : vector<128x128xf32>
    %2 = tpu.matmul %0, %1, %cst {dimension_numbers = #tpu.dot_dimension_numbers<[1], [0], [0], [1], [0, 0, 1, 1], [], []>} : vector<128x128xbf16>, vector<128x128xbf16>, vector<128x128xf32> -> vector<128x128xf32>
    %3 = arith.truncf %2 : vector<128x128xf32> to vector<128x128xbf16>
    %c0_3 = arith.constant 0 : index
    %c0_4 = arith.constant 0 : index
    %4 = vector.load %arg3[%c0_3, %c0_4] : memref<128x128xbf16, #tpu.memory_space<vmem>>, vector<128x128xbf16>
    %cst_5 = arith.constant dense<0.000000e+00> : vector<128x128xf32>
    %5 = tpu.matmul %3, %4, %cst_5 {dimension_numbers = #tpu.dot_dimension_numbers<[1], [0], [0], [1], [0, 0, 1, 1], [], []>} : vector<128x128xbf16>, vector<128x128xbf16>, vector<128x128xf32> -> vector<128x128xf32>
    %c0_6 = arith.constant 0 : index
    %c0_7 = arith.constant 0 : index
    %6 = vector.load %arg4[%c0_6, %c0_7] : memref<1x128xf32, #tpu.memory_space<vmem>>, vector<1x128xf32>
    %7 = vector.broadcast %6 : vector<1x128xf32> to vector<128x128xf32>
    %8 = arith.addf %5, %7 : vector<128x128xf32>
    %cst_8 = arith.constant 0.000000e+00 : f32
    %9 = vector.broadcast %cst_8 : f32 to vector<128x128xf32>
    %10 = arith.maximumf %8, %9 : vector<128x128xf32>
    %11 = arith.truncf %10 : vector<128x128xf32> to vector<128x128xbf16>
    %cst_9 = arith.constant dense<0.000000e+00> : vector<128x128xf32>
    %12 = tpu.matmul %0, %11, %cst_9 {dimension_numbers = #tpu.dot_dimension_numbers<[1], [0], [0], [1], [0, 0, 1, 1], [], []>} : vector<128x128xbf16>, vector<128x128xbf16>, vector<128x128xf32> -> vector<128x128xf32>
    %13 = arith.truncf %12 : vector<128x128xf32> to vector<128x128xbf16>
    %c0_10 = arith.constant 0 : index
    %c0_11 = arith.constant 0 : index
    %14 = vector.load %arg5[%c0_10, %c0_11] : memref<128x128xbf16, #tpu.memory_space<vmem>>, vector<128x128xbf16>
    %cst_12 = arith.constant dense<0.000000e+00> : vector<128x128xf32>
    %15 = tpu.matmul %13, %14, %cst_12 {dimension_numbers = #tpu.dot_dimension_numbers<[1], [0], [0], [1], [0, 0, 1, 1], [], []>} : vector<128x128xbf16>, vector<128x128xbf16>, vector<128x128xf32> -> vector<128x128xf32>
    %c0_13 = arith.constant 0 : index
    %c0_14 = arith.constant 0 : index
    %16 = vector.load %arg6[%c0_13, %c0_14] : memref<1x128xf32, #tpu.memory_space<vmem>>, vector<1x128xf32>
    %17 = vector.broadcast %16 : vector<1x128xf32> to vector<128x128xf32>
    %18 = arith.addf %15, %17 : vector<128x128xf32>
    %19 = arith.negf %18 : vector<128x128xf32>
    %20 = math.exp %19 : vector<128x128xf32>
    %cst_15 = arith.constant 1.000000e+00 : f32
    %21 = vector.broadcast %cst_15 : f32 to vector<128x128xf32>
    %22 = arith.addf %21, %20 : vector<128x128xf32>
    %23 = arith.divf %21, %22 : vector<128x128xf32>
    %c0_16 = arith.constant 0 : index
    %c0_17 = arith.constant 0 : index
    %24 = vector.load %arg7[%c0_16, %c0_17] : memref<128x128xf32, #tpu.memory_space<vmem>>, vector<128x128xf32>
    tpu.vector_store %arg7[%c0_16, %c0_17], %23 {strides = array<i32>} : memref<128x128xf32, #tpu.memory_space<vmem>>, vector<128x128xf32>,
    return
  }
  func.func @transform_0(%arg0: i32) -> (i32, i32) {
    %c0_i32 = arith.constant 0 : i32
    %c0_i32_0 = arith.constant 0 : i32
    %c0_i32_1 = arith.constant 0 : i32
    return %c0_i32, %c0_i32_0 : i32, i32
  }
  func.func @transform_1(%arg0: i32) -> (i32, i32) {
    %c0_i32 = arith.constant 0 : i32
    %c0_i32_0 = arith.constant 0 : i32
    %c0_i32_1 = arith.constant 0 : i32
    return %c0_i32, %c0_i32_0 : i32, i32
  }
  func.func @transform_2(%arg0: i32) -> (i32, i32) {
    %c0_i32 = arith.constant 0 : i32
    %c0_i32_0 = arith.constant 0 : i32
    %c0_i32_1 = arith.constant 0 : i32
    return %c0_i32, %c0_i32_0 : i32, i32
  }
  func.func @transform_3(%arg0: i32) -> (i32, i32) {
    %c0_i32 = arith.constant 0 : i32
    %c0_i32_0 = arith.constant 0 : i32
    %c0_i32_1 = arith.constant 0 : i32
    return %c0_i32, %c0_i32_0 : i32, i32
  }
  func.func @transform_4(%arg0: i32) -> (i32, i32) {
    %c0_i32 = arith.constant 0 : i32
    %c0_i32_0 = arith.constant 0 : i32
    %c0_i32_1 = arith.constant 0 : i32
    return %c0_i32, %c0_i32_0 : i32, i32
  }
  func.func @transform_5(%arg0: i32) -> (i32, i32) {
    %c0_i32 = arith.constant 0 : i32
    %c0_i32_0 = arith.constant 0 : i32
    %c0_i32_1 = arith.constant 0 : i32
    return %c0_i32, %c0_i32_0 : i32, i32
  }
  func.func @transform_6(%arg0: i32) -> (i32, i32) {
    %c0_i32 = arith.constant 0 : i32
    %c0_i32_0 = arith.constant 0 : i32
    %c0_i32_1 = arith.constant 0 : i32
    return %c0_i32, %c0_i32_0 : i32, i32
  }
}

</mosaic_0001>

<bundles_post_ra>
// kernel: gcn_forward_padded.1
= control target key start
LH: loop header
LB: loop body
LE: loop exit
PB: predicated region body
PF: predicated region fallthrough
CT: control target
= control target key end

     0   :  { %11 = vsyncpa [#allocation3], 0  ;;  %s1422_s0 = inlined_call_operand.hbm [shape: bf16[128,128], index: 0, kind: input, shape index: {}]   ;;  %s1423_s1 = inlined_call_operand.hbm [shape: bf16[128,128], index: 1, kind: input, shape index: {}]   ;;  %s1424_s2 = inlined_call_operand.hbm [shape: bf16[128,128], index: 2, kind: input, shape index: {}]   ;;  %s1425_s3 = inlined_call_operand.vmem [shape: f32[1,128], index: 3, kind: input, shape index: {}]   ;;  %s1426_s4 = inlined_call_operand.hbm [shape: bf16[128,128], index: 4, kind: input, shape index: {}]   ;;  %s1427_s5 = inlined_call_operand.vmem [shape: f32[1,128], index: 5, kind: input, shape index: {}]   ;;  %s1428_s6 = inlined_call_operand.hbm [shape: f32[128,128], index: 6, kind: output, shape index: {}]  }
   0x1   :  { %12 = vsyncpa [#allocation6], 0 }
   0x2   :  { %13 = vsyncpa [#allocation9], 0 }
   0x3   :  { %14 = vsyncpa [#allocation4], 0  ;;  %s32_s23 = sshll.u32 %s1423_s1, 4  ;;  %s1307_s24 = smov [#allocation5]   ;;  %s33_s23 = int_to_ptr.hbm [resolvable:$true] %s32_s23 }
   0x4   :  { %s34_s25 = sshll.u32 %s1307_s24, 4  ;;  %s19_s28 = sshll.u32 %s1422_s0, 4  ;;  %s35_s25 = int_to_ptr.vmem [resolvable:$true] %s34_s25  ;;  %s20_s28 = int_to_ptr.hbm [resolvable:$true] %s19_s28 }
   0x5   :  { %s1308_s29 = smov 64   ;;  %s1309_s30 = smov 4  }
   0x6   :  { %40 = dma.hbm_to_vmem [thread:$0]  %s33_s23, 1024, %s35_s25, [#allocation6], %s1308_s29, %s1308_s29, %s1309_s30  }
   0x7   :  { %s1310_s7 = smov [#allocation2]   ;;  %s45_s11 = sshll.u32 %s1424_s2, 4  ;;  %s46_s11 = int_to_ptr.hbm [resolvable:$true] %s45_s11 }
   0x8   :  { %s21_s8 = sshll.u32 %s1310_s7, 4  ;;  %s60_s13 = sshll.u32 %s1426_s4, 4  ;;  %s22_s8 = int_to_ptr.vmem [resolvable:$true] %s21_s8  ;;  %s61_s13 = int_to_ptr.hbm [resolvable:$true] %s60_s13 }
   0x9   :  { %27 = dma.hbm_to_vmem [thread:$0]  %s20_s28, 1024, %s22_s8, [#allocation3], %s1308_s29, %s1308_s29, %s1309_s30  }
   0xa   :  { %s1311_s14 = smov [#allocation7]   ;;  %s1312_s0 = smov [#allocation8]  }
   0xb   :  { %s47_s15 = sshll.u32 %s1311_s14, 4  ;;  %s62_s16 = sshll.u32 %s1312_s0, 4  ;;  %s48_s15 = int_to_ptr.vmem [resolvable:$true] %s47_s15  ;;  %s63_s16 = int_to_ptr.vmem [resolvable:$true] %s62_s16 }
   0xc   :  { %53 = dma.hbm_to_vmem [thread:$0]  %s46_s11, 1024, %s48_s15, [#allocation6], %s1308_s29, %s1308_s29, %s1309_s30  }
   0xd   :  { %68 = dma.hbm_to_vmem [thread:$0]  %s61_s13, 1024, %s63_s16, [#allocation9], %s1308_s29, %s1308_s29, %s1309_s30  }
   0xe   :  { %1299 = dma.done.wait [#allocation3], 1024  }
   0xf   :  { %1300 = vsyncadd [#allocation3], 4294966272 }
  0x10   :  { %1301 = dma.done.wait [#allocation6], 2048  }
  0x11   :  { %1302 = vsyncadd [#allocation6], 4294965248 }
  0x12   :  { %1303 = dma.done.wait [#allocation9], 1024  }
  0x13   :  { %1304 = vsyncadd [#allocation9], 4294966272  ;;  %v1087_v0 = vld [vmem:[#allocation5 + $0x38] sm:$0xff]  ;;  %v1086_v1 = vld [vmem:[#allocation5 + $0x30] sm:$0xff]  ;;  %s913_s21 = sshll.u32 %s1428_s6, 4  ;;  %s1314_s22 = smov 128   ;;  %s914_s21 = int_to_ptr.hbm [resolvable:$true] %s913_s21 }
  0x14   :  { %215 = vmatpush.bf16.msra.mxu0 %v1087_v0  ;;  %v1085_v2 = vld [vmem:[#allocation5 + $0x28] sm:$0xff]  ;;  %v1084_v3 = vld [vmem:[#allocation5 + $0x20] sm:$0xff]  ;;  %v1083_v4 = vld [vmem:[#allocation5 + $0x18] sm:$0xff]  ;;  %s1315_s23 = smov 8  }
  0x15   :  { %v1082_v5 = vld [vmem:[#allocation5 + $0x10] sm:$0xff]  ;;  %v1081_v6 = vld [vmem:[#allocation5 + $0x8] sm:$0xff]  ;;  %v1080_v7 = vld [vmem:[#allocation5] sm:$0xff] }
  0x16   :  { %v1363_v8 = vld [vmem:[#allocation2] sm:$0xff]  ;;  %v1366_v9 = vld [vmem:[#allocation2 + $0x8] sm:$0xff]  ;;  %v1369_v10 = vld [vmem:[#allocation2 + $0x10] sm:$0xff] }
  0x17   :  { %v1372_v11 = vld [vmem:[#allocation2 + $0x18] sm:$0xff]  ;;  %v1375_v12 = vld [vmem:[#allocation2 + $0x20] sm:$0xff]  ;;  %v1094_v14 = vld [vmem:[#allocation7 + $0x30] sm:$0xff] }
  0x18   :  { %216 = vmatpush.bf16.msra.mxu0 %v1086_v1  ;;  %v1095_v13 = vld [vmem:[#allocation7 + $0x38] sm:$0xff]  ;;  %v1378_v15 = vld [vmem:[#allocation2 + $0x28] sm:$0xff]  ;;  %v1092_v17 = vld [vmem:[#allocation7 + $0x20] sm:$0xff] }
  0x19   :  { %340 = vmatpush.bf16.msra.mxu1 %v1095_v13  ;;  %v1093_v16 = vld [vmem:[#allocation7 + $0x28] sm:$0xff]  ;;  %v1091_v18 = vld [vmem:[#allocation7 + $0x18] sm:$0xff]  ;;  %v1090_v19 = vld [vmem:[#allocation7 + $0x10] sm:$0xff] }
  0x1a   :  { %v1381_v20 = vld [vmem:[#allocation2 + $0x30] sm:$0xff]  ;;  %v1089_v21 = vld [vmem:[#allocation7 + $0x8] sm:$0xff]  ;;  %v1088_v22 = vld [vmem:[#allocation7] sm:$0xff] }
  0x1b   :  { %v1384_v23 = vld [vmem:[#allocation2 + $0x38] sm:$0xff]  ;;  %v1113_v49 = vld [vmem:[%s1425_s3] ss:$0 sm:$0xff] }
  0x1c   :  { %217 = vmatpush.bf16.msra.mxu0 %v1085_v2 }
  0x1d   :  { %341 = vmatpush.bf16.msra.mxu1 %v1094_v14 }
  0x20   :  { %218 = vmatpush.bf16.msra.mxu0 %v1084_v3 }
  0x21   :  { %342 = vmatpush.bf16.msra.mxu1 %v1093_v16 }
  0x24   :  { %219 = vmatpush.bf16.msra.mxu0 %v1083_v4 }
  0x25   :  { %343 = vmatpush.bf16.msra.mxu1 %v1092_v17 }
  0x28   :  { %220 = vmatpush.bf16.msra.mxu0 %v1082_v5 }
  0x29   :  { %344 = vmatpush.bf16.msra.mxu1 %v1091_v18 }
  0x2c   :  { %221 = vmatpush.bf16.msra.mxu0 %v1081_v6 }
  0x2d   :  { %345 = vmatpush.bf16.msra.mxu1 %v1090_v19 }
  0x30   :  { %222 = vmatpush.bf16.msra.mxu0 %v1080_v7 }
  0x31   :  { %346 = vmatpush.bf16.msra.mxu1 %v1089_v21 }
  0x33   :  { %223 = vmatmul.bf16.vlgmr.msra.gmra.mxu0 %v1363_v8 }
  0x35   :  { %347 = vmatpush.bf16.msra.mxu1 %v1088_v22 }
  0x43   :  { %228 = vmatmul.bf16.gmra.mxu0 %v1366_v9 }
  0x53   :  { %233 = vmatmul.bf16.gmra.mxu0 %v1369_v10 }
  0x63   :  { %238 = vmatmul.bf16.gmra.mxu0 %v1372_v11 }
  0x73   :  { %243 = vmatmul.bf16.gmra.mxu0 %v1375_v12 }
  0x83   :  { %248 = vmatmul.bf16.gmra.mxu0 %v1378_v15 }
  0x93   :  { %253 = vmatmul.bf16.gmra.mxu0 %v1381_v20 }
  0xa3   :  { %258 = vmatmul.bf16.gmra.mxu0 %v1384_v23 }
  0xb0   :  { %v224_v24 = vpop.f32.mrf.mxu0 }
  0xb8   :  { %v226_v25 = vpop.f32.mrf.mxu0 }
  0xb9   :  { %v264_v26 = vpack.c.bf16 %v226_v25, %v224_v24 }
  0xbb   :  { %348 = vmatmul.bf16.vlgmr.msra.gmra.mxu1 %v264_v26 }
  0xc0   :  { %v229_v27 = vpop.f32.mrf.mxu0 }
  0xc8   :  { %v231_v28 = vpop.f32.mrf.mxu0 }
  0xc9   :  { %v265_v29 = vpack.c.bf16 %v231_v28, %v229_v27 }
  0xcb   :  { %353 = vmatmul.bf16.gmra.mxu1 %v265_v29 }
  0xd0   :  { %v234_v30 = vpop.f32.mrf.mxu0 }
  0xd8   :  { %v236_v31 = vpop.f32.mrf.mxu0 }
  0xd9   :  { %v266_v32 = vpack.c.bf16 %v236_v31, %v234_v30 }
  0xdb   :  { %358 = vmatmul.bf16.gmra.mxu1 %v266_v32 }
  0xe0   :  { %v239_v33 = vpop.f32.mrf.mxu0 }
  0xe8   :  { %v241_v34 = vpop.f32.mrf.mxu0 }
  0xe9   :  { %v267_v35 = vpack.c.bf16 %v241_v34, %v239_v33 }
  0xeb   :  { %363 = vmatmul.bf16.gmra.mxu1 %v267_v35 }
  0xf0   :  { %v244_v36 = vpop.f32.mrf.mxu0 }
  0xf8   :  { %v246_v37 = vpop.f32.mrf.mxu0 }
  0xf9   :  { %v268_v38 = vpack.c.bf16 %v246_v37, %v244_v36 }
  0xfb   :  { %368 = vmatmul.bf16.gmra.mxu1 %v268_v38 }
 0x100   :  { %v249_v39 = vpop.f32.mrf.mxu0 }
 0x108   :  { %v251_v40 = vpop.f32.mrf.mxu0 }
 0x109   :  { %v269_v41 = vpack.c.bf16 %v251_v40, %v249_v39 }
 0x10b   :  { %373 = vmatmul.bf16.gmra.mxu1 %v269_v41 }
 0x110   :  { %v254_v42 = vpop.f32.mrf.mxu0 }
 0x118   :  { %v256_v43 = vpop.f32.mrf.mxu0 }
 0x119   :  { %v270_v44 = vpack.c.bf16 %v256_v43, %v254_v42 }
 0x11b   :  { %378 = vmatmul.bf16.gmra.mxu1 %v270_v44 }
 0x120   :  { %v259_v45 = vpop.f32.mrf.mxu0 }
 0x128   :  { %v261_v46 = vpop.f32.mrf.mxu0 }
 0x129   :  { %v271_v47 = vpack.c.bf16 %v261_v46, %v259_v45 }
 0x12b   :  { %383 = vmatmul.bf16.gmra.mxu1 %v271_v47 }
 0x138   :  { %v349_v48 = vpop.f32.mrf.mxu1 }
 0x139   :  { %v350_v50 = vadd.f32 %v1113_v49, %v349_v48 }
 0x13b   :  { %v389_v53 = vmax.f32 %v350_v50, 0.0  ;;  %v1102_v50 = vld [vmem:[#allocation8 + $0x30] sm:$0xff] }
 0x140   :  { %v351_v51 = vpop.f32.mrf.mxu1 }
 0x141   :  { %v352_v52 = vadd.f32 %v1113_v49, %v351_v51  ;;  %v1101_v51 = vld [vmem:[#allocation8 + $0x28] sm:$0xff] }
 0x143   :  { %v390_v54 = vmax.f32 %v352_v52, 0.0  ;;  %v1100_v52 = vld [vmem:[#allocation8 + $0x20] sm:$0xff] }
 0x145   :  { %v405_v55 = vpack.c.bf16 %v390_v54, %v389_v53  ;;  %v1099_v53 = vld [vmem:[#allocation8 + $0x18] sm:$0xff] }
 0x148   :  { %v354_v56 = vpop.f32.mrf.mxu1 }
 0x149   :  { %v355_v57 = vadd.f32 %v1113_v49, %v354_v56 }
 0x14b   :  { %v391_v60 = vmax.f32 %v355_v57, 0.0 }
 0x150   :  { %v356_v58 = vpop.f32.mrf.mxu1 }
 0x151   :  { %v357_v59 = vadd.f32 %v1113_v49, %v356_v58 }
 0x153   :  { %v392_v61 = vmax.f32 %v357_v59, 0.0 }
 0x155   :  { %v406_v62 = vpack.c.bf16 %v392_v61, %v391_v60 }
 0x158   :  { %v359_v63 = vpop.f32.mrf.mxu1 }
 0x159   :  { %v360_v0 = vadd.f32 %v1113_v49, %v359_v63 }
 0x15b   :  { %v393_v3 = vmax.f32 %v360_v0, 0.0 }
 0x160   :  { %v361_v1 = vpop.f32.mrf.mxu1 }
 0x161   :  { %v362_v2 = vadd.f32 %v1113_v49, %v361_v1 }
 0x163   :  { %v394_v4 = vmax.f32 %v362_v2, 0.0 }
 0x165   :  { %v407_v5 = vpack.c.bf16 %v394_v4, %v393_v3 }
 0x168   :  { %v364_v6 = vpop.f32.mrf.mxu1 }
 0x169   :  { %v365_v7 = vadd.f32 %v1113_v49, %v364_v6 }
 0x16b   :  { %v395_v16 = vmax.f32 %v365_v7, 0.0 }
 0x170   :  { %v366_v13 = vpop.f32.mrf.mxu1 }
 0x171   :  { %v367_v14 = vadd.f32 %v1113_v49, %v366_v13 }
 0x173   :  { %v396_v17 = vmax.f32 %v367_v14, 0.0  ;;  %v1401_v14 = vld [vmem:[%s1427_s5] ss:$0 sm:$0xff]  ;;  %s1313_s5 = smov [#allocation10]  }
 0x174   :  { %s911_s18 = sshll.u32 %s1313_s5, 4  ;;  %s912_s18 = int_to_ptr.vmem [resolvable:$true] %s911_s18 }
 0x175   :  { %v408_v18 = vpack.c.bf16 %v396_v17, %v395_v16 }
 0x178   :  { %v369_v19 = vpop.f32.mrf.mxu1 }
 0x179   :  { %v370_v43 = vadd.f32 %v1113_v49, %v369_v19 }
 0x17b   :  { %v397_v47 = vmax.f32 %v370_v43, 0.0 }
 0x180   :  { %v371_v21 = vpop.f32.mrf.mxu1 }
 0x181   :  { %v372_v40 = vadd.f32 %v1113_v49, %v371_v21 }
 0x183   :  { %v398_v45 = vmax.f32 %v372_v40, 0.0 }
 0x185   :  { %v409_v48 = vpack.c.bf16 %v398_v45, %v397_v47 }
 0x188   :  { %v374_v22 = vpop.f32.mrf.mxu1 }
 0x189   :  { %v375_v38 = vadd.f32 %v1113_v49, %v374_v22 }
 0x18b   :  { %v399_v44 = vmax.f32 %v375_v38, 0.0 }
 0x190   :  { %v376_v24 = vpop.f32.mrf.mxu1 }
 0x191   :  { %v377_v35 = vadd.f32 %v1113_v49, %v376_v24 }
 0x193   :  { %v400_v41 = vmax.f32 %v377_v35, 0.0 }
 0x195   :  { %v410_v46 = vpack.c.bf16 %v400_v41, %v399_v44 }
 0x198   :  { %v379_v25 = vpop.f32.mrf.mxu1 }
 0x199   :  { %v380_v32 = vadd.f32 %v1113_v49, %v379_v25 }
 0x19b   :  { %v401_v39 = vmax.f32 %v380_v32, 0.0 }
 0x1a0   :  { %v381_v26 = vpop.f32.mrf.mxu1 }
 0x1a1   :  { %v382_v30 = vadd.f32 %v1113_v49, %v381_v26 }
 0x1a3   :  { %v402_v36 = vmax.f32 %v382_v30, 0.0 }
 0x1a5   :  { %v411_v42 = vpack.c.bf16 %v402_v36, %v401_v39 }
 0x1a8   :  { %v384_v27 = vpop.f32.mrf.mxu1 }
 0x1a9   :  { %v385_v28 = vadd.f32 %v1113_v49, %v384_v27 }
 0x1ab   :  { %v403_v33 = vmax.f32 %v385_v28, 0.0 }
 0x1b0   :  { %v386_v29 = vpop.f32.mrf.mxu1 }
 0x1b1   :  { %v387_v31 = vadd.f32 %v1113_v49, %v386_v29  ;;  %v1103_v49 = vld [vmem:[#allocation8 + $0x38] sm:$0xff] }
 0x1b2   :  { %538 = vmatpush.bf16.msra.mxu3 %v1103_v49 }
 0x1b3   :  { %v404_v34 = vmax.f32 %v387_v31, 0.0 }
 0x1b5   :  { %v412_v37 = vpack.c.bf16 %v404_v34, %v403_v33 }
 0x1b6   :  { %539 = vmatpush.bf16.msra.mxu3 %v1102_v50 }
 0x1b7   :  { %413 = vmatpush.bf16.msra.mxu2 %v412_v37 }
 0x1ba   :  { %540 = vmatpush.bf16.msra.mxu3 %v1101_v51 }
 0x1bb   :  { %414 = vmatpush.bf16.msra.mxu2 %v411_v42 }
 0x1be   :  { %541 = vmatpush.bf16.msra.mxu3 %v1100_v52 }
 0x1bf   :  { %415 = vmatpush.bf16.msra.mxu2 %v410_v46 }
 0x1c2   :  { %542 = vmatpush.bf16.msra.mxu3 %v1099_v53 }
 0x1c3   :  { %416 = vmatpush.bf16.msra.mxu2 %v409_v48 }
 0x1c7   :  { %417 = vmatpush.bf16.msra.mxu2 %v408_v18 }
 0x1cb   :  { %418 = vmatpush.bf16.msra.mxu2 %v407_v5 }
 0x1cf   :  { %419 = vmatpush.bf16.msra.mxu2 %v406_v62 }
 0x1d3   :  { %420 = vmatpush.bf16.msra.mxu2 %v405_v55 }
 0x1d6   :  { %421 = vmatmul.bf16.vlgmr.msra.gmra.mxu2 %v1363_v8  ;;  %v1098_v8 = vld [vmem:[#allocation8 + $0x10] sm:$0xff] }
 0x1d7   :  { %543 = vmatpush.bf16.msra.mxu3 %v1098_v8 }
 0x1e6   :  { %426 = vmatmul.bf16.gmra.mxu2 %v1366_v9  ;;  %v1097_v9 = vld [vmem:[#allocation8 + $0x8] sm:$0xff] }
 0x1e7   :  { %544 = vmatpush.bf16.msra.mxu3 %v1097_v9 }
 0x1f6   :  { %431 = vmatmul.bf16.gmra.mxu2 %v1369_v10  ;;  %v1096_v10 = vld [vmem:[#allocation8] sm:$0xff] }
 0x1f7   :  { %545 = vmatpush.bf16.msra.mxu3 %v1096_v10 }
 0x206   :  { %436 = vmatmul.bf16.gmra.mxu2 %v1372_v11 }
 0x216   :  { %441 = vmatmul.bf16.gmra.mxu2 %v1375_v12 }
 0x226   :  { %446 = vmatmul.bf16.gmra.mxu2 %v1378_v15 }
 0x236   :  { %451 = vmatmul.bf16.gmra.mxu2 %v1381_v20 }
 0x246   :  { %456 = vmatmul.bf16.gmra.mxu2 %v1384_v23 }
 0x259   :  { %v422_v11 = vpop.f32.mrf.mxu2 }
 0x261   :  { %v424_v12 = vpop.f32.mrf.mxu2 }
 0x262   :  { %v462_v15 = vpack.c.bf16 %v424_v12, %v422_v11 }
 0x264   :  { %546 = vmatmul.bf16.vlgmr.msra.gmra.mxu3 %v462_v15 }
 0x269   :  { %v427_v54 = vpop.f32.mrf.mxu2 }
 0x271   :  { %v429_v55 = vpop.f32.mrf.mxu2 }
 0x272   :  { %v463_v56 = vpack.c.bf16 %v429_v55, %v427_v54 }
 0x274   :  { %551 = vmatmul.bf16.gmra.mxu3 %v463_v56 }
 0x279   :  { %v432_v57 = vpop.f32.mrf.mxu2 }
 0x281   :  { %v434_v58 = vpop.f32.mrf.mxu2 }
 0x282   :  { %v464_v59 = vpack.c.bf16 %v434_v58, %v432_v57 }
 0x284   :  { %556 = vmatmul.bf16.gmra.mxu3 %v464_v59 }
 0x289   :  { %v437_v20 = vpop.f32.mrf.mxu2 }
 0x291   :  { %v439_v60 = vpop.f32.mrf.mxu2 }
 0x292   :  { %v465_v61 = vpack.c.bf16 %v439_v60, %v437_v20 }
 0x294   :  { %561 = vmatmul.bf16.gmra.mxu3 %v465_v61 }
 0x299   :  { %v442_v62 = vpop.f32.mrf.mxu2 }
 0x2a1   :  { %v444_v63 = vpop.f32.mrf.mxu2 }
 0x2a2   :  { %v466_v0 = vpack.c.bf16 %v444_v63, %v442_v62 }
 0x2a4   :  { %566 = vmatmul.bf16.gmra.mxu3 %v466_v0 }
 0x2a9   :  { %v447_v23 = vpop.f32.mrf.mxu2 }
 0x2b1   :  { %v449_v1 = vpop.f32.mrf.mxu2 }
 0x2b2   :  { %v467_v2 = vpack.c.bf16 %v449_v1, %v447_v23 }
 0x2b4   :  { %571 = vmatmul.bf16.gmra.mxu3 %v467_v2 }
 0x2b9   :  { %v452_v3 = vpop.f32.mrf.mxu2 }
 0x2c1   :  { %v454_v4 = vpop.f32.mrf.mxu2 }
 0x2c2   :  { %v468_v5 = vpack.c.bf16 %v454_v4, %v452_v3 }
 0x2c4   :  { %576 = vmatmul.bf16.gmra.mxu3 %v468_v5 }
 0x2c9   :  { %v457_v6 = vpop.f32.mrf.mxu2 }
 0x2d1   :  { %v459_v7 = vpop.f32.mrf.mxu2 }
 0x2d2   :  { %v469_v13 = vpack.c.bf16 %v459_v7, %v457_v6 }
 0x2d4   :  { %581 = vmatmul.bf16.gmra.mxu3 %v469_v13 }
 0x2e7   :  { %v547_v16 = vpop.f32.mrf.mxu3 }
 0x2e8   :  { %v548_v17 = vadd.f32 %v1401_v14, %v547_v16 }
 0x2ea   :  { %v1056_v18 = vmul.f32 -1.442695, %v548_v17 }
 0x2ec   :  { %1115 = vpow2.f32 %v1056_v18 }
 0x2ef   :  { %v549_v19 = vpop.f32.mrf.mxu3 }
 0x2f0   :  { %v550_v21 = vadd.f32 %v1401_v14, %v549_v19 }
 0x2f2   :  { %v1116_v22 = vpop.eup %1115  ;;  %v1057_v24 = vmul.f32 -1.442695, %v550_v21 }
 0x2f3   :  { %v635_v25 = vadd.f32 1.0, %v1116_v22 }
 0x2f4   :  { %1117 = vpow2.f32 %v1057_v24 }
 0x2f5   :  { %1119 = vrcp.f32 %v635_v25  ;;  %v662_v34 = vand.u32 2147483648, %v635_v25  ;;  %v660_v37 = vand.u32 2147483647, %v635_v25  ;;  %vm656_vm1 = vweird.f32 %v635_v25 }
 0x2f7   :  { %v552_v26 = vpop.f32.mrf.mxu3  ;;  %v663_v43 = vor.u32 1.1754944e-38, %v662_v34  ;;  %vm661_vm3 = vcmp.eq.f32.partialorder %v660_v37, 8.507059e+37 }
 0x2f8   :  { %v553_v27 = vadd.f32 %v1401_v14, %v552_v26 }
 0x2fa   :  { %v1118_v28 = vpop.eup %1117  ;;  %v1058_v29 = vmul.f32 -1.442695, %v553_v27 }
 0x2fb   :  { %v1120_v30 = vpop.eup %1119  ;;  %v636_v31 = vadd.f32 1.0, %v1118_v28 }
 0x2fc   :  { %v652_v32 = vmul.f32 %v1120_v30, %v635_v25  ;;  %1121 = vpow2.f32 %v1058_v29  ;;  %vm657_vm0 = vweird.f32 %v1120_v30 }
 0x2fd   :  { %1123 = vrcp.f32 %v636_v31  ;;  %vm658_vm2 = vmor %vm656_vm1, %vm657_vm0  ;;  %v677_v49 = vand.u32 2147483648, %v636_v31  ;;  %v675_v52 = vand.u32 2147483647, %v636_v31  ;;  %vm671_vm5 = vweird.f32 %v636_v31 }
 0x2fe   :  { %v653_v33 = vsub.f32 1.0, %v652_v32 }
 0x2ff   :  { %v554_v35 = vpop.f32.mrf.mxu3  ;;  %v678_v12 = vor.u32 1.1754944e-38, %v677_v49  ;;  %vm676_vm7 = vcmp.eq.f32.partialorder %v675_v52, 8.507059e+37 }
 0x300   :  { %v654_v36 = vmul.f32 %v1120_v30, %v653_v33  ;;  %v555_v38 = vadd.f32 %v1401_v14, %v554_v35 }
 0x302   :  { %v1122_v39 = vpop.eup %1121  ;;  %v655_v40 = vadd.f32 %v1120_v30, %v654_v36  ;;  %v1059_v41 = vmul.f32 -1.442695, %v555_v38 }
 0x303   :  { %v1124_v42 = vpop.eup %1123  ;;  %v637_v44 = vadd.f32 1.0, %v1122_v39 }
 0x304   :  { %v659_v45 = vsel %vm658_vm2, %v1120_v30, %v655_v40  ;;  %v667_v46 = vmul.f32 %v1124_v42, %v636_v31  ;;  %1125 = vpow2.f32 %v1059_v41  ;;  %vm672_vm4 = vweird.f32 %v1124_v42 }
 0x305   :  { %v664_v47 = vsel %vm661_vm3, %v663_v43, %v659_v45  ;;  %1127 = vrcp.f32 %v637_v44  ;;  %vm673_vm6 = vmor %vm671_vm5, %vm672_vm4  ;;  %v692_v58 = vand.u32 2147483648, %v637_v44  ;;  %v690_v60 = vand.u32 2147483647, %v637_v44 }
 0x306   :  { %891 = vst [vmem:[#allocation10] sm:$0xff] %v664_v47  ;;  %v668_v48 = vsub.f32 1.0, %v667_v46  ;;  %vm686_vm9 = vweird.f32 %v637_v44 }
 0x307   :  { %v557_v50 = vpop.f32.mrf.mxu3  ;;  %v693_v1 = vor.u32 1.1754944e-38, %v692_v58  ;;  %vm691_vm11 = vcmp.eq.f32.partialorder %v690_v60, 8.507059e+37 }
 0x308   :  { %v669_v51 = vmul.f32 %v1124_v42, %v668_v48  ;;  %v558_v53 = vadd.f32 %v1401_v14, %v557_v50 }
 0x30a   :  { %v1126_v8 = vpop.eup %1125  ;;  %v670_v9 = vadd.f32 %v1124_v42, %v669_v51  ;;  %v1060_v10 = vmul.f32 -1.442695, %v558_v53 }
 0x30b   :  { %v1128_v11 = vpop.eup %1127  ;;  %v638_v15 = vadd.f32 1.0, %v1126_v8 }
 0x30c   :  { %v674_v54 = vsel %vm673_vm6, %v1124_v42, %v670_v9  ;;  %v682_v55 = vmul.f32 %v1128_v11, %v637_v44  ;;  %1129 = vpow2.f32 %v1060_v10  ;;  %vm687_vm8 = vweird.f32 %v1128_v11 }
 0x30d   :  { %v679_v56 = vsel %vm676_vm7, %v678_v12, %v674_v54  ;;  %1131 = vrcp.f32 %v638_v15  ;;  %vm688_vm10 = vmor %vm686_vm9, %vm687_vm8  ;;  %v707_v7 = vand.u32 2147483648, %v638_v15  ;;  %v705_v17 = vand.u32 2147483647, %v638_v15 }
 0x30e   :  { %892 = vst [vmem:[#allocation10 + $0x8] sm:$0xff] %v679_v56  ;;  %v683_v57 = vsub.f32 1.0, %v682_v55  ;;  %vm701_vm13 = vweird.f32 %v638_v15 }
 0x30f   :  { %v559_v59 = vpop.f32.mrf.mxu3  ;;  %v708_v25 = vor.u32 1.1754944e-38, %v707_v7  ;;  %vm706_vm15 = vcmp.eq.f32.partialorder %v705_v17, 8.507059e+37 }
 0x310   :  { %v684_v20 = vmul.f32 %v1128_v11, %v683_v57  ;;  %v560_v61 = vadd.f32 %v1401_v14, %v559_v59 }
 0x312   :  { %v1130_v62 = vpop.eup %1129  ;;  %v685_v63 = vadd.f32 %v1128_v11, %v684_v20  ;;  %v1061_v0 = vmul.f32 -1.442695, %v560_v61 }
 0x313   :  { %v1132_v23 = vpop.eup %1131  ;;  %v639_v2 = vadd.f32 1.0, %v1130_v62 }
 0x314   :  { %v689_v3 = vsel %vm688_vm10, %v1128_v11, %v685_v63  ;;  %v697_v4 = vmul.f32 %v1132_v23, %v638_v15  ;;  %1133 = vpow2.f32 %v1061_v0  ;;  %vm702_vm12 = vweird.f32 %v1132_v23 }
 0x315   :  { %v694_v5 = vsel %vm691_vm11, %v693_v1, %v689_v3  ;;  %1135 = vrcp.f32 %v639_v2  ;;  %vm703_vm14 = vmor %vm701_vm13, %vm702_vm12  ;;  %v722_v31 = vand.u32 2147483648, %v639_v2  ;;  %v720_v34 = vand.u32 2147483647, %v639_v2 }
 0x316   :  { %893 = vst [vmem:[#allocation10 + $0x10] sm:$0xff] %v694_v5  ;;  %v698_v6 = vsub.f32 1.0, %v697_v4  ;;  %vm716_vm1 = vweird.f32 %v639_v2 }
 0x317   :  { %v562_v13 = vpop.f32.mrf.mxu3  ;;  %v723_v40 = vor.u32 1.1754944e-38, %v722_v31  ;;  %vm721_vm3 = vcmp.eq.f32.partialorder %v720_v34, 8.507059e+37 }
 0x318   :  { %v699_v16 = vmul.f32 %v1132_v23, %v698_v6  ;;  %v563_v18 = vadd.f32 %v1401_v14, %v562_v13 }
 0x31a   :  { %v1134_v19 = vpop.eup %1133  ;;  %v700_v21 = vadd.f32 %v1132_v23, %v699_v16  ;;  %v1062_v22 = vmul.f32 -1.442695, %v563_v18 }
 0x31b   :  { %v1136_v24 = vpop.eup %1135  ;;  %v640_v26 = vadd.f32 1.0, %v1134_v19 }
 0x31c   :  { %v704_v27 = vsel %vm703_vm14, %v1132_v23, %v700_v21  ;;  %v712_v28 = vmul.f32 %v1136_v24, %v639_v2  ;;  %1137 = vpow2.f32 %v1062_v22  ;;  %vm717_vm0 = vweird.f32 %v1136_v24 }
 0x31d   :  { %v709_v29 = vsel %vm706_vm15, %v708_v25, %v704_v27  ;;  %1139 = vrcp.f32 %v640_v26  ;;  %vm718_vm2 = vmor %vm716_vm1, %vm717_vm0  ;;  %v737_v46 = vand.u32 2147483648, %v640_v26  ;;  %v735_v49 = vand.u32 2147483647, %v640_v26 }
 0x31e   :  { %894 = vst [vmem:[#allocation10 + $0x18] sm:$0xff] %v709_v29  ;;  %v713_v30 = vsub.f32 1.0, %v712_v28  ;;  %vm731_vm5 = vweird.f32 %v640_v26 }
 0x31f   :  { %v564_v32 = vpop.f32.mrf.mxu3  ;;  %v738_v9 = vor.u32 1.1754944e-38, %v737_v46  ;;  %vm736_vm7 = vcmp.eq.f32.partialorder %v735_v49, 8.507059e+37 }
 0x320   :  { %v714_v33 = vmul.f32 %v1136_v24, %v713_v30  ;;  %v565_v35 = vadd.f32 %v1401_v14, %v564_v32 }
 0x322   :  { %v1138_v36 = vpop.eup %1137  ;;  %v715_v37 = vadd.f32 %v1136_v24, %v714_v33  ;;  %v1063_v38 = vmul.f32 -1.442695, %v565_v35 }
 0x323   :  { %v1140_v39 = vpop.eup %1139  ;;  %v641_v41 = vadd.f32 1.0, %v1138_v36 }
 0x324   :  { %v719_v42 = vsel %vm718_vm2, %v1136_v24, %v715_v37  ;;  %v727_v43 = vmul.f32 %v1140_v39, %v640_v26  ;;  %1141 = vpow2.f32 %v1063_v38  ;;  %vm732_vm4 = vweird.f32 %v1140_v39 }
 0x325   :  { %v724_v44 = vsel %vm721_vm3, %v723_v40, %v719_v42  ;;  %1143 = vrcp.f32 %v641_v41  ;;  %vm733_vm6 = vmor %vm731_vm5, %vm732_vm4  ;;  %v752_v55 = vand.u32 2147483648, %v641_v41  ;;  %v750_v58 = vand.u32 2147483647, %v641_v41 }
 0x326   :  { %895 = vst [vmem:[#allocation10 + $0x20] sm:$0xff] %v724_v44  ;;  %v728_v45 = vsub.f32 1.0, %v727_v43  ;;  %vm746_vm9 = vweird.f32 %v641_v41 }
 0x327   :  { %v567_v47 = vpop.f32.mrf.mxu3  ;;  %v753_v63 = vor.u32 1.1754944e-38, %v752_v55  ;;  %vm751_vm11 = vcmp.eq.f32.partialorder %v750_v58, 8.507059e+37 }
 0x328   :  { %v729_v48 = vmul.f32 %v1140_v39, %v728_v45  ;;  %v568_v50 = vadd.f32 %v1401_v14, %v567_v47 }
 0x32a   :  { %v1142_v51 = vpop.eup %1141  ;;  %v730_v52 = vadd.f32 %v1140_v39, %v729_v48  ;;  %v1064_v53 = vmul.f32 -1.442695, %v568_v50 }
 0x32b   :  { %v1144_v8 = vpop.eup %1143  ;;  %v642_v10 = vadd.f32 1.0, %v1142_v51 }
 0x32c   :  { %v734_v11 = vsel %vm733_vm6, %v1140_v39, %v730_v52  ;;  %v742_v12 = vmul.f32 %v1144_v8, %v641_v41  ;;  %1145 = vpow2.f32 %v1064_v53  ;;  %vm747_vm8 = vweird.f32 %v1144_v8 }
 0x32d   :  { %v739_v15 = vsel %vm736_vm7, %v738_v9, %v734_v11  ;;  %1147 = vrcp.f32 %v642_v10  ;;  %vm748_vm10 = vmor %vm746_vm9, %vm747_vm8  ;;  %v767_v4 = vand.u32 2147483648, %v642_v10  ;;  %v765_v7 = vand.u32 2147483647, %v642_v10 }
 0x32e   :  { %896 = vst [vmem:[#allocation10 + $0x28] sm:$0xff] %v739_v15  ;;  %v743_v54 = vsub.f32 1.0, %v742_v12  ;;  %vm761_vm13 = vweird.f32 %v642_v10 }
 0x32f   :  { %v569_v56 = vpop.f32.mrf.mxu3  ;;  %v768_v21 = vor.u32 1.1754944e-38, %v767_v4  ;;  %vm766_vm15 = vcmp.eq.f32.partialorder %v765_v7, 8.507059e+37 }
 0x330   :  { %v744_v57 = vmul.f32 %v1144_v8, %v743_v54  ;;  %v570_v59 = vadd.f32 %v1401_v14, %v569_v56 }
 0x332   :  { %v1146_v20 = vpop.eup %1145  ;;  %v745_v60 = vadd.f32 %v1144_v8, %v744_v57  ;;  %v1065_v61 = vmul.f32 -1.442695, %v570_v59 }
 0x333   :  { %v1148_v62 = vpop.eup %1147  ;;  %v643_v0 = vadd.f32 1.0, %v1146_v20 }
 0x334   :  { %v749_v23 = vsel %vm748_vm10, %v1144_v8, %v745_v60  ;;  %v757_v1 = vmul.f32 %v1148_v62, %v642_v10  ;;  %1149 = vpow2.f32 %v1065_v61  ;;  %vm762_vm12 = vweird.f32 %v1148_v62 }
 0x335   :  { %v754_v2 = vsel %vm751_vm11, %v753_v63, %v749_v23  ;;  %1151 = vrcp.f32 %v643_v0  ;;  %vm763_vm14 = vmor %vm761_vm13, %vm762_vm12  ;;  %v782_v28 = vand.u32 2147483648, %v643_v0  ;;  %v780_v31 = vand.u32 2147483647, %v643_v0 }
 0x336   :  { %897 = vst [vmem:[#allocation10 + $0x30] sm:$0xff] %v754_v2  ;;  %v758_v3 = vsub.f32 1.0, %v757_v1  ;;  %vm776_vm1 = vweird.f32 %v643_v0 }
 0x337   :  { %v572_v5 = vpop.f32.mrf.mxu3  ;;  %v783_v37 = vor.u32 1.1754944e-38, %v782_v28  ;;  %vm781_vm3 = vcmp.eq.f32.partialorder %v780_v31, 8.507059e+37 }
 0x338   :  { %v759_v6 = vmul.f32 %v1148_v62, %v758_v3  ;;  %v573_v13 = vadd.f32 %v1401_v14, %v572_v5 }
 0x33a   :  { %v1150_v16 = vpop.eup %1149  ;;  %v760_v17 = vadd.f32 %v1148_v62, %v759_v6  ;;  %v1066_v18 = vmul.f32 -1.442695, %v573_v13 }
 0x33b   :  { %v1152_v19 = vpop.eup %1151  ;;  %v644_v22 = vadd.f32 1.0, %v1150_v16 }
 0x33c   :  { %v764_v24 = vsel %vm763_vm14, %v1148_v62, %v760_v17  ;;  %v772_v25 = vmul.f32 %v1152_v19, %v643_v0  ;;  %1153 = vpow2.f32 %v1066_v18  ;;  %vm777_vm0 = vweird.f32 %v1152_v19 }
 0x33d   :  { %v769_v26 = vsel %vm766_vm15, %v768_v21, %v764_v24  ;;  %1155 = vrcp.f32 %v644_v22  ;;  %vm778_vm2 = vmor %vm776_vm1, %vm777_vm0  ;;  %v797_v43 = vand.u32 2147483648, %v644_v22  ;;  %v795_v46 = vand.u32 2147483647, %v644_v22 }
 0x33e   :  { %898 = vst [vmem:[#allocation10 + $0x38] sm:$0xff] %v769_v26  ;;  %v773_v27 = vsub.f32 1.0, %v772_v25  ;;  %vm791_vm5 = vweird.f32 %v644_v22 }
 0x33f   :  { %v574_v29 = vpop.f32.mrf.mxu3  ;;  %v798_v52 = vor.u32 1.1754944e-38, %v797_v43  ;;  %vm796_vm7 = vcmp.eq.f32.partialorder %v795_v46, 8.507059e+37 }
 0x340   :  { %v774_v30 = vmul.f32 %v1152_v19, %v773_v27  ;;  %v575_v32 = vadd.f32 %v1401_v14, %v574_v29 }
 0x342   :  { %v1154_v33 = vpop.eup %1153  ;;  %v775_v34 = vadd.f32 %v1152_v19, %v774_v30  ;;  %v1067_v35 = vmul.f32 -1.442695, %v575_v32 }
 0x343   :  { %v1156_v36 = vpop.eup %1155  ;;  %v645_v38 = vadd.f32 1.0, %v1154_v33 }
 0x344   :  { %v779_v39 = vsel %vm778_vm2, %v1152_v19, %v775_v34  ;;  %v787_v40 = vmul.f32 %v1156_v36, %v644_v22  ;;  %1157 = vpow2.f32 %v1067_v35  ;;  %vm792_vm4 = vweird.f32 %v1156_v36 }
 0x345   :  { %v784_v41 = vsel %vm781_vm3, %v783_v37, %v779_v39  ;;  %1159 = vrcp.f32 %v645_v38  ;;  %vm793_vm6 = vmor %vm791_vm5, %vm792_vm4  ;;  %v812_v12 = vand.u32 2147483648, %v645_v38  ;;  %v810_v55 = vand.u32 2147483647, %v645_v38 }
 0x346   :  { %899 = vst [vmem:[#allocation10 + $0x40] sm:$0xff] %v784_v41  ;;  %v788_v42 = vsub.f32 1.0, %v787_v40  ;;  %vm806_vm9 = vweird.f32 %v645_v38 }
 0x347   :  { %v577_v44 = vpop.f32.mrf.mxu3  ;;  %v813_v60 = vor.u32 1.1754944e-38, %v812_v12  ;;  %vm811_vm11 = vcmp.eq.f32.partialorder %v810_v55, 8.507059e+37 }
 0x348   :  { %v789_v45 = vmul.f32 %v1156_v36, %v788_v42  ;;  %v578_v47 = vadd.f32 %v1401_v14, %v577_v44 }
 0x34a   :  { %v1158_v48 = vpop.eup %1157  ;;  %v790_v49 = vadd.f32 %v1156_v36, %v789_v45  ;;  %v1068_v50 = vmul.f32 -1.442695, %v578_v47 }
 0x34b   :  { %v1160_v51 = vpop.eup %1159  ;;  %v646_v53 = vadd.f32 1.0, %v1158_v48 }
 0x34c   :  { %v794_v8 = vsel %vm793_vm6, %v1156_v36, %v790_v49  ;;  %v802_v9 = vmul.f32 %v1160_v51, %v645_v38  ;;  %1161 = vpow2.f32 %v1068_v50  ;;  %vm807_vm8 = vweird.f32 %v1160_v51 }
 0x34d   :  { %v799_v10 = vsel %vm796_vm7, %v798_v52, %v794_v8  ;;  %1163 = vrcp.f32 %v646_v53  ;;  %vm808_vm10 = vmor %vm806_vm9, %vm807_vm8  ;;  %v827_v1 = vand.u32 2147483648, %v646_v53  ;;  %v825_v4 = vand.u32 2147483647, %v646_v53 }
 0x34e   :  { %900 = vst [vmem:[#allocation10 + $0x48] sm:$0xff] %v799_v10  ;;  %v803_v11 = vsub.f32 1.0, %v802_v9  ;;  %vm821_vm13 = vweird.f32 %v646_v53 }
 0x34f   :  { %v579_v15 = vpop.f32.mrf.mxu3  ;;  %v828_v17 = vor.u32 1.1754944e-38, %v827_v1  ;;  %vm826_vm15 = vcmp.eq.f32.partialorder %v825_v4, 8.507059e+37 }
 0x350   :  { %v804_v54 = vmul.f32 %v1160_v51, %v803_v11  ;;  %v580_v56 = vadd.f32 %v1401_v14, %v579_v15 }
 0x352   :  { %v1162_v57 = vpop.eup %1161  ;;  %v805_v58 = vadd.f32 %v1160_v51, %v804_v54  ;;  %v1069_v59 = vmul.f32 -1.442695, %v580_v56 }
 0x353   :  { %v1164_v20 = vpop.eup %1163  ;;  %v647_v61 = vadd.f32 1.0, %v1162_v57 }
 0x354   :  { %v809_v62 = vsel %vm808_vm10, %v1160_v51, %v805_v58  ;;  %v817_v63 = vmul.f32 %v1164_v20, %v646_v53  ;;  %1165 = vpow2.f32 %v1069_v59  ;;  %vm822_vm12 = vweird.f32 %v1164_v20 }
 0x355   :  { %v814_v0 = vsel %vm811_vm11, %v813_v60, %v809_v62  ;;  %1167 = vrcp.f32 %v647_v61  ;;  %vm823_vm14 = vmor %vm821_vm13, %vm822_vm12  ;;  %v842_v25 = vand.u32 2147483648, %v647_v61  ;;  %v840_v28 = vand.u32 2147483647, %v647_v61 }
 0x356   :  { %901 = vst [vmem:[#allocation10 + $0x50] sm:$0xff] %v814_v0  ;;  %v818_v23 = vsub.f32 1.0, %v817_v63  ;;  %vm836_vm1 = vweird.f32 %v647_v61 }
 0x357   :  { %v582_v2 = vpop.f32.mrf.mxu3  ;;  %v843_v34 = vor.u32 1.1754944e-38, %v842_v25  ;;  %vm841_vm3 = vcmp.eq.f32.partialorder %v840_v28, 8.507059e+37 }
 0x358   :  { %v819_v3 = vmul.f32 %v1164_v20, %v818_v23  ;;  %v583_v5 = vadd.f32 %v1401_v14, %v582_v2 }
 0x35a   :  { %v1166_v6 = vpop.eup %1165  ;;  %v820_v7 = vadd.f32 %v1164_v20, %v819_v3  ;;  %v1070_v13 = vmul.f32 -1.442695, %v583_v5 }
 0x35b   :  { %v1168_v16 = vpop.eup %1167  ;;  %v648_v18 = vadd.f32 1.0, %v1166_v6 }
 0x35c   :  { %v824_v19 = vsel %vm823_vm14, %v1164_v20, %v820_v7  ;;  %v832_v21 = vmul.f32 %v1168_v16, %v647_v61  ;;  %1169 = vpow2.f32 %v1070_v13  ;;  %vm837_vm0 = vweird.f32 %v1168_v16 }
 0x35d   :  { %v829_v22 = vsel %vm826_vm15, %v828_v17, %v824_v19  ;;  %1171 = vrcp.f32 %v648_v18  ;;  %vm838_vm2 = vmor %vm836_vm1, %vm837_vm0  ;;  %v857_v40 = vand.u32 2147483648, %v648_v18  ;;  %vm851_vm5 = vweird.f32 %v648_v18 }
 0x35e   :  { %902 = vst [vmem:[#allocation10 + $0x58] sm:$0xff] %v829_v22  ;;  %v833_v24 = vsub.f32 1.0, %v832_v21 }
 0x35f   :  { %v584_v26 = vpop.f32.mrf.mxu3  ;;  %v858_v45 = vor.u32 1.1754944e-38, %v857_v40 }
 0x360   :  { %v834_v27 = vmul.f32 %v1168_v16, %v833_v24  ;;  %v585_v29 = vadd.f32 %v1401_v14, %v584_v26  ;;  %v855_v14 = vand.u32 2147483647, %v648_v18 }
 0x362   :  { %v1170_v30 = vpop.eup %1169  ;;  %v835_v31 = vadd.f32 %v1168_v16, %v834_v27  ;;  %v1071_v32 = vmul.f32 -1.442695, %v585_v29  ;;  %vm856_vm7 = vcmp.eq.f32.partialorder %v855_v14, 8.507059e+37 }
 0x363   :  { %v1172_v33 = vpop.eup %1171  ;;  %v649_v35 = vadd.f32 1.0, %v1170_v30 }
 0x364   :  { %v839_v36 = vsel %vm838_vm2, %v1168_v16, %v835_v31  ;;  %v847_v37 = vmul.f32 %v1172_v33, %v648_v18  ;;  %1173 = vpow2.f32 %v1071_v32  ;;  %vm852_vm4 = vweird.f32 %v1172_v33 }
 0x365   :  { %v844_v38 = vsel %vm841_vm3, %v843_v34, %v839_v36  ;;  %1175 = vrcp.f32 %v649_v35  ;;  %vm853_vm6 = vmor %vm851_vm5, %vm852_vm4  ;;  %v872_v51 = vand.u32 2147483648, %v649_v35  ;;  %v870_v53 = vand.u32 2147483647, %v649_v35 }
 0x366   :  { %903 = vst [vmem:[#allocation10 + $0x60] sm:$0xff] %v844_v38  ;;  %v848_v39 = vsub.f32 1.0, %v847_v37  ;;  %vm866_vm9 = vweird.f32 %v649_v35 }
 0x367   :  { %v873_v10 = vor.u32 1.1754944e-38, %v872_v51  ;;  %vm871_vm11 = vcmp.eq.f32.partialorder %v870_v53, 8.507059e+37 }
 0x368   :  { %v849_v41 = vmul.f32 %v1172_v33, %v848_v39 }
 0x36a   :  { %v1174_v42 = vpop.eup %1173  ;;  %v850_v43 = vadd.f32 %v1172_v33, %v849_v41 }
 0x36b   :  { %v1176_v44 = vpop.eup %1175  ;;  %v650_v46 = vadd.f32 1.0, %v1174_v42 }
 0x36c   :  { %v854_v47 = vsel %vm853_vm6, %v1172_v33, %v850_v43  ;;  %v862_v48 = vmul.f32 %v1176_v44, %v649_v35  ;;  %vm867_vm8 = vweird.f32 %v1176_v44 }
 0x36d   :  { %v859_v49 = vsel %vm856_vm7, %v858_v45, %v854_v47  ;;  %1177 = vrcp.f32 %v650_v46  ;;  %vm868_vm10 = vmor %vm866_vm9, %vm867_vm8  ;;  %v887_v55 = vand.u32 2147483648, %v650_v46  ;;  %v885_v57 = vand.u32 2147483647, %v650_v46 }
 0x36e   :  { %904 = vst [vmem:[#allocation10 + $0x68] sm:$0xff] %v859_v49  ;;  %v863_v50 = vsub.f32 1.0, %v862_v48  ;;  %vm881_vm13 = vweird.f32 %v650_v46 }
 0x36f   :  { %v888_v59 = vor.u32 1.1754944e-38, %v887_v55  ;;  %vm886_vm15 = vcmp.eq.f32.partialorder %v885_v57, 8.507059e+37 }
 0x370   :  { %v864_v52 = vmul.f32 %v1176_v44, %v863_v50 }
 0x372   :  { %v865_v8 = vadd.f32 %v1176_v44, %v864_v52 }
 0x373   :  { %v1178_v9 = vpop.eup %1177 }
 0x374   :  { %v869_v11 = vsel %vm868_vm10, %v1176_v44, %v865_v8  ;;  %v877_v12 = vmul.f32 %v1178_v9, %v650_v46  ;;  %vm882_vm12 = vweird.f32 %v1178_v9 }
 0x375   :  { %v874_v15 = vsel %vm871_vm11, %v873_v10, %v869_v11  ;;  %vm883_vm14 = vmor %vm881_vm13, %vm882_vm12 }
 0x376   :  { %905 = vst [vmem:[#allocation10 + $0x70] sm:$0xff] %v874_v15  ;;  %v878_v54 = vsub.f32 1.0, %v877_v12 }
 0x378   :  { %v879_v56 = vmul.f32 %v1178_v9, %v878_v54 }
 0x37a   :  { %v880_v58 = vadd.f32 %v1178_v9, %v879_v56 }
 0x37c   :  { %v884_v20 = vsel %vm883_vm14, %v1178_v9, %v880_v58 }
 0x37d   :  { %v889_v60 = vsel %vm886_vm15, %v888_v59, %v884_v20 }
 0x37e   :  { %906 = vst [vmem:[#allocation10 + $0x78] sm:$0xff] %v889_v60 }
 0x37f   :  { %919 = dma.vmem_to_hbm [thread:$0]  %s912_s18, 2048, %s914_s21, [#allocation4], %s1314_s22, %s1314_s22, %s1315_s23  }
 0x380   :  { %1305 = dma.done.wait [#allocation4], 2048  }
 0x381   :  { %1306 = vsyncadd [#allocation4], 4294965248 }
 0x382   :  { %924 = vsyncpa [#allocation3], 1 }
 0x383   :  { %925 = vsyncpa [#allocation6], 1 }
 0x384   :  { %926 = vsyncpa [#allocation9], 1 }
 0x385   :  { %927 = vsyncpa [#allocation4], 1 }

</bundles_post_ra>
